<compile_context>
chip_gen: v7x
topology: tpu7x:2x2x1
jax: 0.10.0
libtpu: 0.0.40
codegen_flags: <defaults>
</compile_context>

<pallas_src>
import functools
import math

import jax
import jax.numpy as jnp
from jax import lax
from jax.experimental import pallas as pl
from jax.experimental.pallas import tpu as pltpu


def _attention_head_kernel(x_ref, wq_ref, wk_ref, wv_ref, o_ref, *, tokens):
    BT, E = x_ref.shape
    H = o_ref.shape[-1]
    T = tokens
    B = BT // T

    x = x_ref[...]                                    # (B*T, E), single load
    inv_sqrt_h = 1.0 / math.sqrt(H)

    # Three small projections (no fused-QKV lane-offset slicing).  The softmax
    # scale is folded into Q: same math, and it touches the (B*T, H) tensor
    # instead of the (B, T, T) scores.
    q = jnp.dot(x, wq_ref[...], preferred_element_type=jnp.float32) * inv_sqrt_h
    k = jnp.dot(x, wk_ref[...], preferred_element_type=jnp.float32)
    v = jnp.dot(x, wv_ref[...], preferred_element_type=jnp.float32)

    # Causal (tril) mask built once; T is static.
    row = lax.broadcasted_iota(jnp.int32, (T, T), 0)
    col = lax.broadcasted_iota(jnp.int32, (T, T), 1)
    causal = col <= row

    # Static unroll over the tiny batch: every slice is sublane-aligned
    # (T = 8 rows), so no cross-lane relayouts; all dots are plain 2-D dots.
    for b in range(B):
        lo = b * T
        qb = q[lo:lo + T, :]
        kb = k[lo:lo + T, :]
        vb = v[lo:lo + T, :]

        # Q @ K^T contracted over H without materializing a transpose.
        s = lax.dot_general(qb, kb, (((1,), (1,)), ((), ())),
                            preferred_element_type=jnp.float32)       # (T, T)
        s = jnp.where(causal, s, -jnp.inf)

        # Numerically stable softmax; the diagonal is never masked, so each
        # row's max is finite.  Exact divide (EUP is not the bottleneck here).
        s = s - jnp.max(s, axis=-1, keepdims=True)
        p = jnp.exp(s)
        p = p / jnp.sum(p, axis=-1, keepdims=True)

        # TODO(synk): training-mode dropout on the attention probabilities is
        # omitted (eval-mode identity, matches module.eval()).

        ob = jnp.dot(p, vb, preferred_element_type=jnp.float32)       # (T, H)
        o_ref[lo:lo + T, :] = ob.astype(o_ref.dtype)


@jax.jit
def attention_head(x, wq, wk, wv):
    """x: (B, T, E) f32; wq/wk/wv: (E, H) f32 -> (B, T, H) f32."""
    B, T, E = x.shape
    H = wq.shape[1]

    # Contiguous flatten in the wrapper: free layout plumbing handled by XLA,
    # gives the kernel a single (B*T, E) projection matmul per weight.
    x2d = x.reshape(B * T, E)

    # Whole problem is ~20 KiB -> one grid-less invocation (no per-step
    # pipeline overhead); everything stays resident in VMEM.
    out2d = pl.pallas_call(
        functools.partial(_attention_head_kernel, tokens=T),
        out_shape=jax.ShapeDtypeStruct((B * T, H), x.dtype),
        in_specs=[pl.BlockSpec(memory_space=pltpu.MemorySpace.VMEM)] * 4,
        out_specs=pl.BlockSpec(memory_space=pltpu.MemorySpace.VMEM),
    )(x2d, wq, wk, wv)

    return out2d.reshape(B, T, H)


def _reference(x, wq, wk, wv):
    hp = lax.Precision.HIGHEST
    q = jnp.dot(x, wq, precision=hp)
    k = jnp.dot(x, wk, precision=hp)
    v = jnp.dot(x, wv, precision=hp)
    scores = jnp.einsum("btd,bsd->bts", q, k, precision=hp)
    T = x.shape[1]
    mask = jnp.tril(jnp.ones((T, T)))
    scores = jnp.where(mask == 0, -jnp.inf, scores)
    scores = scores / (k.shape[-1] ** 0.5)
    p = jax.nn.softmax(scores, axis=-1)
    return jnp.einsum("bts,bsd->btd", p, v, precision=hp)


if __name__ == "__main__":
    # config: embedding_dim=64, heads_num=4 -> head_size = 64 // 4 = 16
    batch = 2
    seq = 8                 # tokens_num <= context_size (32)
    embedding_dim = 64
    head_size = 16

    key = jax.random.PRNGKey(0)
    kx, kq, kk, kv = jax.random.split(key, 4)

    x = jax.random.normal(kx, (batch, seq, embedding_dim), dtype=jnp.float32)
    # deterministic "Linear" weight init (Kaiming-uniform-ish), stored as (E, H)
    bound = 1.0 / math.sqrt(embedding_dim)
    wq = jax.random.uniform(kq, (embedding_dim, head_size), jnp.float32, -bound, bound)
    wk = jax.random.uniform(kk, (embedding_dim, head_size), jnp.float32, -bound, bound)
    wv = jax.random.uniform(kv, (embedding_dim, head_size), jnp.float32, -bound, bound)

    out = jax.block_until_ready(attention_head(x, wq, wk, wv))
    ref = _reference(x, wq, wk, wv)

    assert out.shape == (batch, seq, head_size)
    assert jnp.allclose(out, ref, atol=1e-4, rtol=1e-4), float(
        jnp.max(jnp.abs(out - ref)))

    print("KERNEL_OK")
</pallas_src>

<mosaic_0001>
module attributes {stable_mosaic.version = 11 : i64} {
  func.func @_attention_head_kernel(%arg0: memref<16x64xf32, #tpu.memory_space<vmem>>, %arg1: memref<64x16xf32, #tpu.memory_space<vmem>>, %arg2: memref<64x16xf32, #tpu.memory_space<vmem>>, %arg3: memref<64x16xf32, #tpu.memory_space<vmem>>, %arg4: memref<16x16xf32, #tpu.memory_space<vmem>>) attributes {dimension_semantics = [], scalar_prefetch = 0 : i64, scratch_operands = 0 : i64, tpu.core_type = #tpu.core_type<tc>} {
    %c0 = arith.constant 0 : index
    %c0_0 = arith.constant 0 : index
    %0 = vector.load %arg0[%c0, %c0_0] : memref<16x64xf32, #tpu.memory_space<vmem>>, vector<16x64xf32>
    %c0_1 = arith.constant 0 : index
    %c0_2 = arith.constant 0 : index
    %1 = vector.load %arg1[%c0_1, %c0_2] : memref<64x16xf32, #tpu.memory_space<vmem>>, vector<64x16xf32>
    %cst = arith.constant dense<0.000000e+00> : vector<16x16xf32>
    %2 = tpu.matmul %0, %1, %cst {dimension_numbers = #tpu.dot_dimension_numbers<[1], [0], [0], [1], [0, 0, 1, 1], [], []>} : vector<16x64xf32>, vector<64x16xf32>, vector<16x16xf32> -> vector<16x16xf32>
    %cst_3 = arith.constant 2.500000e-01 : f32
    %3 = vector.broadcast %cst_3 : f32 to vector<16x16xf32>
    %4 = arith.mulf %2, %3 : vector<16x16xf32>
    %c0_4 = arith.constant 0 : index
    %c0_5 = arith.constant 0 : index
    %5 = vector.load %arg2[%c0_4, %c0_5] : memref<64x16xf32, #tpu.memory_space<vmem>>, vector<64x16xf32>
    %cst_6 = arith.constant dense<0.000000e+00> : vector<16x16xf32>
    %6 = tpu.matmul %0, %5, %cst_6 {dimension_numbers = #tpu.dot_dimension_numbers<[1], [0], [0], [1], [0, 0, 1, 1], [], []>} : vector<16x64xf32>, vector<64x16xf32>, vector<16x16xf32> -> vector<16x16xf32>
    %c0_7 = arith.constant 0 : index
    %c0_8 = arith.constant 0 : index
    %7 = vector.load %arg3[%c0_7, %c0_8] : memref<64x16xf32, #tpu.memory_space<vmem>>, vector<64x16xf32>
    %cst_9 = arith.constant dense<0.000000e+00> : vector<16x16xf32>
    %8 = tpu.matmul %0, %7, %cst_9 {dimension_numbers = #tpu.dot_dimension_numbers<[1], [0], [0], [1], [0, 0, 1, 1], [], []>} : vector<16x64xf32>, vector<64x16xf32>, vector<16x16xf32> -> vector<16x16xf32>
    %9 = tpu.iota {dimensions = array<i32: 0>} : vector<8x8xi32>
    %10 = tpu.iota {dimensions = array<i32: 1>} : vector<8x8xi32>
    %11 = arith.cmpi sle, %10, %9 : vector<8x8xi32>
    %12 = vector.extract_strided_slice %4 {offsets = [0, 0], sizes = [8, 16], strides = [1, 1]} : vector<16x16xf32> to vector<8x16xf32>
    %13 = vector.extract_strided_slice %6 {offsets = [0, 0], sizes = [8, 16], strides = [1, 1]} : vector<16x16xf32> to vector<8x16xf32>
    %14 = vector.extract_strided_slice %8 {offsets = [0, 0], sizes = [8, 16], strides = [1, 1]} : vector<16x16xf32> to vector<8x16xf32>
    %cst_10 = arith.constant dense<0.000000e+00> : vector<8x8xf32>
    %15 = tpu.matmul %12, %13, %cst_10 {dimension_numbers = #tpu.dot_dimension_numbers<[1], [1], [0], [0], [0, 0, 1, 0], [], []>} : vector<8x16xf32>, vector<8x16xf32>, vector<8x8xf32> -> vector<8x8xf32>
    %cst_11 = arith.constant 0xFF800000 : f32
    %16 = vector.broadcast %cst_11 : f32 to vector<8x8xf32>
    %17 = arith.select %11, %15, %16 : vector<8x8xi1>, vector<8x8xf32>
    %cst_12 = arith.constant dense<0xFF800000> : vector<8xf32>
    %18 = vector.multi_reduction <maximumf>, %17, %cst_12 [1] : vector<8x8xf32> to vector<8xf32>
    %19 = vector.shape_cast %18 : vector<8xf32> to vector<8x1xf32>
    %20 = vector.broadcast %19 : vector<8x1xf32> to vector<8x8xf32>
    %21 = arith.subf %17, %20 : vector<8x8xf32>
    %22 = math.exp %21 : vector<8x8xf32>
    %cst_13 = arith.constant dense<0.000000e+00> : vector<8xf32>
    %23 = vector.multi_reduction <add>, %22, %cst_13 [1] : vector<8x8xf32> to vector<8xf32>
    %24 = vector.shape_cast %23 : vector<8xf32> to vector<8x1xf32>
    %25 = vector.broadcast %24 : vector<8x1xf32> to vector<8x8xf32>
    %26 = arith.divf %22, %25 : vector<8x8xf32>
    %cst_14 = arith.constant dense<0.000000e+00> : vector<8x16xf32>
    %27 = tpu.matmul %26, %14, %cst_14 {dimension_numbers = #tpu.dot_dimension_numbers<[1], [0], [0], [1], [0, 0, 1, 1], [], []>} : vector<8x8xf32>, vector<8x16xf32>, vector<8x16xf32> -> vector<8x16xf32>
    %c0_15 = arith.constant 0 : index
    %c0_16 = arith.constant 0 : index
    %28 = vector.load %arg4[%c0_15, %c0_16] : memref<16x16xf32, #tpu.memory_space<vmem>>, vector<8x16xf32>
    tpu.vector_store %arg4[%c0_15, %c0_16], %27 {strides = array<i32>} : memref<16x16xf32, #tpu.memory_space<vmem>>, vector<8x16xf32>,
    %29 = vector.extract_strided_slice %4 {offsets = [8, 0], sizes = [8, 16], strides = [1, 1]} : vector<16x16xf32> to vector<8x16xf32>
    %30 = vector.extract_strided_slice %6 {offsets = [8, 0], sizes = [8, 16], strides = [1, 1]} : vector<16x16xf32> to vector<8x16xf32>
    %31 = vector.extract_strided_slice %8 {offsets = [8, 0], sizes = [8, 16], strides = [1, 1]} : vector<16x16xf32> to vector<8x16xf32>
    %cst_17 = arith.constant dense<0.000000e+00> : vector<8x8xf32>
    %32 = tpu.matmul %29, %30, %cst_17 {dimension_numbers = #tpu.dot_dimension_numbers<[1], [1], [0], [0], [0, 0, 1, 0], [], []>} : vector<8x16xf32>, vector<8x16xf32>, vector<8x8xf32> -> vector<8x8xf32>
    %cst_18 = arith.constant 0xFF800000 : f32
    %33 = vector.broadcast %cst_18 : f32 to vector<8x8xf32>
    %34 = arith.select %11, %32, %33 : vector<8x8xi1>, vector<8x8xf32>
    %cst_19 = arith.constant dense<0xFF800000> : vector<8xf32>
    %35 = vector.multi_reduction <maximumf>, %34, %cst_19 [1] : vector<8x8xf32> to vector<8xf32>
    %36 = vector.shape_cast %35 : vector<8xf32> to vector<8x1xf32>
    %37 = vector.broadcast %36 : vector<8x1xf32> to vector<8x8xf32>
    %38 = arith.subf %34, %37 : vector<8x8xf32>
    %39 = math.exp %38 : vector<8x8xf32>
    %cst_20 = arith.constant dense<0.000000e+00> : vector<8xf32>
    %40 = vector.multi_reduction <add>, %39, %cst_20 [1] : vector<8x8xf32> to vector<8xf32>
    %41 = vector.shape_cast %40 : vector<8xf32> to vector<8x1xf32>
    %42 = vector.broadcast %41 : vector<8x1xf32> to vector<8x8xf32>
    %43 = arith.divf %39, %42 : vector<8x8xf32>
    %cst_21 = arith.constant dense<0.000000e+00> : vector<8x16xf32>
    %44 = tpu.matmul %43, %31, %cst_21 {dimension_numbers = #tpu.dot_dimension_numbers<[1], [0], [0], [1], [0, 0, 1, 1], [], []>} : vector<8x8xf32>, vector<8x16xf32>, vector<8x16xf32> -> vector<8x16xf32>
    %c8 = arith.constant 8 : index
    %c0_22 = arith.constant 0 : index
    %45 = vector.load %arg4[%c8, %c0_22] : memref<16x16xf32, #tpu.memory_space<vmem>>, vector<8x16xf32>
    tpu.vector_store %arg4[%c8, %c0_22], %44 {strides = array<i32>} : memref<16x16xf32, #tpu.memory_space<vmem>>, vector<8x16xf32>,
    return
  }
}

</mosaic_0001>

<bundles_post_ra>
// kernel: attention_head.1
= control target key start
LH: loop header
LB: loop body
LE: loop exit
PB: predicated region body
PF: predicated region fallthrough
CT: control target
= control target key end

     0   :  { %vm28_vm0 = vcmask 523264   ;;  %s989_s0 = inlined_call_operand.vmem [shape: f32[16,64], index: 0, kind: input, shape index: {}]   ;;  %s990_s1 = inlined_call_operand.vmem [shape: f32[64,16], index: 1, kind: input, shape index: {}]   ;;  %s991_s2 = inlined_call_operand.vmem [shape: f32[64,16], index: 2, kind: input, shape index: {}]   ;;  %s992_s3 = inlined_call_operand.vmem [shape: f32[64,16], index: 3, kind: input, shape index: {}]   ;;  %s993_s4 = inlined_call_operand.hbm [shape: f32[16,16], index: 4, kind: output, shape index: {}]  }
   0x1   :  { %v112_v0 = vld [vmem:[%s991_s2] sm:$0xff]  ;;  %v113_v1 = vld [vmem:[%s991_s2 + $0x8] sm:$0xff]  ;;  %v114_v5 = vld [vmem:[%s991_s2 + $0x10] sm:$0xff] }
   0x2   :  { %v20_v2 = vld [vmem:[%s990_s1] sm:$0xff]  ;;  %v768_v3 = vpack.c.bf16 %v113_v1, %v112_v0  ;;  %v21_v4 = vld [vmem:[%s990_s1 + $0x8] sm:$0xff]  ;;  %v115_v6 = vld [vmem:[%s991_s2 + $0x18] sm:$0xff] }
   0x3   :  { %v752_v7 = vpack.c.bf16 %v21_v4, %v20_v2  ;;  %v772_v8 = vpack.c.bf16 %v115_v6, %v114_v5  ;;  %v22_v9 = vld [vmem:[%s990_s1 + $0x10] sm:$0xff]  ;;  %v23_v10 = vld [vmem:[%s990_s1 + $0x18] sm:$0xff]  ;;  %v116_v11 = vld [vmem:[%s991_s2 + $0x20] sm:$0xff] }
   0x4   :  { %769 = vmatprep.subr.bf16.mxu1 %v768_v3  ;;  %v756_v12 = vpack.c.bf16 %v23_v10, %v22_v9  ;;  %v117_v13 = vld [vmem:[%s991_s2 + $0x28] sm:$0xff]  ;;  %v24_v14 = vld [vmem:[%s990_s1 + $0x20] sm:$0xff]  ;;  %v118_v19 = vld [vmem:[%s991_s2 + $0x30] sm:$0xff] }
   0x5   :  { %v25_v15 = vld [vmem:[%s990_s1 + $0x28] sm:$0xff]  ;;  %753 = vmatprep.subr.bf16.mxu0 %v752_v7  ;;  %771 = vmatpush3.bf16.msra.mxu1 %v768_v3  ;;  %v776_v16 = vpack.c.bf16 %v117_v13, %v116_v11  ;;  %v18_v17 = vld [vmem:[%s989_s0] sm:$0xff]  ;;  %v119_v20 = vld [vmem:[%s991_s2 + $0x38] sm:$0xff] }
   0x6   :  { %755 = vmatpush3.bf16.msra.mxu0 %v752_v7  ;;  %773 = vmatprep.subr.bf16.mxu1 %v772_v8  ;;  %v760_v18 = vpack.c.bf16 %v25_v15, %v24_v14 }
   0x7   :  { %757 = vmatprep.subr.bf16.mxu0 %v756_v12  ;;  %710 = vmatprep.mubr.msk.f32.mxu1 %vm28_vm0, %v18_v17 }
   0x8   :  { %9 = vsyncpa [#allocation3], 0  ;;  %v26_v21 = vld [vmem:[%s990_s1 + $0x30] sm:$0xff]  ;;  %v27_v22 = vld [vmem:[%s990_s1 + $0x38] sm:$0xff]  ;;  %691 = vmatprep.mubr.msk.f32.mxu0 %vm28_vm0, %v18_v17  ;;  %v780_v23 = vpack.c.bf16 %v119_v20, %v118_v19  ;;  %v837_v26 = vmov 0.0   ;;  %vm838_vm1 = vmmov 0   ;;  %v278_v44 = vlaneseq }
   0x9   :  { %775 = vmatpush3.bf16.msra.mxu1 %v772_v8  ;;  %v764_v24 = vpack.c.bf16 %v27_v22, %v26_v21  ;;  %v19_v25 = vld [vmem:[%s989_s0 + $0x8] sm:$0xff]  ;;  %vm283_vm2 = vcmask 130048   ;;  %v195_v32 = vld [vmem:[%s992_s3] sm:$0xff]  ;;  %v197_v34 = vld [vmem:[%s992_s3 + $0x10] sm:$0xff]  ;;  %vm361_vm4 = vcmask 64512  }
   0xa   :  { %759 = vmatpush3.bf16.msra.mxu0 %v756_v12  ;;  %777 = vmatprep.subr.bf16.mxu1 %v776_v16  ;;  %v196_v33 = vld [vmem:[%s992_s3 + $0x8] sm:$0xff]  ;;  %v198_v36 = vld [vmem:[%s992_s3 + $0x18] sm:$0xff]  ;;  %v199_v38 = vld [vmem:[%s992_s3 + $0x20] sm:$0xff]  ;;  %v279_v45 = vshrl.u32 %v278_v44, 7  ;;  %v281_v46 = vand.u32 127, %v278_v44 }
   0xb   :  { %761 = vmatprep.subr.bf16.mxu0 %v760_v18  ;;  %v784_v35 = vpack.c.bf16 %v196_v33, %v195_v32  ;;  %v788_v37 = vpack.c.bf16 %v198_v36, %v197_v34  ;;  %v200_v39 = vld [vmem:[%s992_s3 + $0x28] sm:$0xff]  ;;  %v201_v41 = vld [vmem:[%s992_s3 + $0x30] sm:$0xff]  ;;  %v202_v42 = vld [vmem:[%s992_s3 + $0x38] sm:$0xff]  ;;  %s839_s3 = smov [#allocation2]  }
   0xc   :  { %v792_v40 = vpack.c.bf16 %v200_v39, %v199_v38  ;;  %v796_v43 = vpack.c.bf16 %v202_v42, %v201_v41  ;;  %vm282_vm3 = vcmp.le.s32.totalorder %v281_v46, %v279_v45  ;;  %s614_s12 = sshll.u32 %s839_s3, 4  ;;  %s615_s12 = int_to_ptr.vmem [resolvable:$true] %s614_s12 }
   0xd   :  { %779 = vmatpush3.bf16.msra.mxu1 %v776_v16  ;;  %s813_s13 = scalar_lea.vmem %s615_s12, 256  ;;  %p818_p1 = scmp.lt.s32.totalorder %s615_s12, %s615_s12 }
   0xe   :  { %763 = vmatpush3.bf16.msra.mxu0 %v760_v18  ;;  %781 = vmatprep.subr.bf16.mxu1 %v780_v23  ;;  %p814_p0 = scmp.ne.s32.totalorder %s615_s12, %s813_s13  ;;  %p819_p2 = scmp.lt.s32.totalorder %s813_s13, %s813_s13 }
   0xf   :  { %765 = vmatprep.subr.bf16.mxu0 %v764_v24 }
  0x10   :  { %p820_p3 = por %p819_p2, %p818_p1 }
  0x11   :  { %783 = vmatpush3.bf16.msra.mxu1 %v780_v23 }
  0x12   :  { %767 = vmatpush3.bf16.msra.mxu0 %v764_v24  ;;  %732 = vmatprep.subr.mxu1 %v837_v26  ;;  %p821_p4 = pnand %p820_p3, %p814_p0 }
  0x13   :  { %785 = vmatprep.subr.bf16.mxu0 %v784_v35 }
  0x14   :  { %711 = vmatmul.mubr.msk.f32.vlgmr.msra.gmra.mrb[0].mxu1 %vm28_vm0, %v19_v25 }
  0x15   :  { %692 = vmatmul.mubr.msk.f32.vlgmr.msra.gmra.mrb[0].mxu0 %vm28_vm0, %v19_v25  ;;  %734 = vmatprep.mubr.msk.f32.mxu1 %vm838_vm1, %v837_v26 }
  0x16   :  { %729 = vmatprep.mubr.msk.f32.mxu0 %vm28_vm0, %v18_v17  ;;  %787 = vmatpush3.bf16.msra.mxu0 %v784_v35 }
  0x17   :  { %789 = vmatprep.subr.bf16.mxu0 %v788_v37 }
  0x1a   :  { %791 = vmatpush3.bf16.msra.mxu0 %v788_v37 }
  0x1b   :  { %793 = vmatprep.subr.bf16.mxu0 %v792_v40 }
  0x1e   :  { %795 = vmatpush3.bf16.msra.mxu0 %v792_v40 }
  0x1f   :  { %797 = vmatprep.subr.bf16.mxu0 %v796_v43 }
  0x22   :  { %799 = vmatpush3.bf16.msra.mxu0 %v796_v43 }
  0x25   :  { %730 = vmatmul.mubr.msk.f32.vlgmr.msra.gmra.mrb[2].mxu0 %vm28_vm0, %v19_v25 }
  0xe7   :  { %v712_v27 = vpop.f32.mrb[0].mxu1 }
  0xe8   :  { %v693_v28 = vpop.f32.mrb[0].mxu0  ;;  %v186_v29 = vpop.f32.mrb[1].mxu1 }
  0xe9   :  { %v101_v30 = vpop.f32.mrb[1].mxu0  ;;  %733 = vmatpush3.xpose.msk.msra.mxu1 %vm283_vm2, %v186_v29  ;;  %v111_v61 = vmul.f32 0.25, %v693_v28 }
  0xea   :  { %v110_v31 = vmul.f32 0.25, %v101_v30  ;;  %737 = vmatprep.subr.mxu1 %v837_v26 }
  0xec   :  { %735 = vmatmul.mubr.msk.f32.vlgmr.msra.gmra.mrb[2].mxu1 %vm283_vm2, %v110_v31 }
  0xed   :  { %739 = vmatprep.mubr.msk.f32.mxu1 %vm838_vm1, %v837_v26 }
  0xf8   :  { %v731_v56 = vpop.f32.mrb[2].mxu0 }
  0xf9   :  { %v269_v57 = vpop.f32.mrb[3].mxu0 }
  0xfa   :  { %738 = vmatpush3.msra.mxu1 %v269_v57 }
  0xfb   :  { %742 = vmatprep.subr.mxu1 %v837_v26 }
 0x1bf   :  { %v356_v47 = vpop.f32.mrb[2].mxu1 }
 0x1c0   :  { %v360_v48 = vsel %vm282_vm3, %v356_v47, -inf  ;;  %v736_v49 = vpop.f32.mrb[3].mxu1 }
 0x1c1   :  { %v362_v50 = vsel %vm361_vm4, %v360_v48, -inf }
 0x1c2   :  { %363 = vmax.xlane.f32.xlu0 %v362_v50 }
 0x24f   :  { %v364_v51 = vpop.xlane.xlu0 %363 }
 0x250   :  { %v365_v52 = vsub.f32 %v360_v48, %v364_v51 }
 0x252   :  { %v366_v53 = vmul.f32 1.442695, %v365_v52 }
 0x254   :  { %805 = vpow2.f32 %v366_v53 }
 0x25e   :  { %v806_v54 = vpop.eup %805 }
 0x25f   :  { %v368_v55 = vsel %vm361_vm4, %v806_v54, 0.0 }
 0x260   :  { %369 = vadd.xlane.f32.xlu0 %v368_v55 }
 0x2ed   :  { %v370_v58 = vpop.xlane.xlu0 %369 }
 0x2ee   :  { %807 = vrcp.f32 %v370_v58 }
 0x2f8   :  { %v808_v59 = vpop.eup %807 }
 0x2f9   :  { %v372_v60 = vmul.f32 %v808_v59, %v806_v54 }
 0x2fb   :  { %740 = vmatmul.mubr.msk.f32.vlgmr.msra.gmra.mrb[4].mxu1 %vm361_vm4, %v372_v60 }
 0x2fc   :  { %743 = vmatpush3.xpose.msk.msra.mxu1 %vm283_vm2, %v712_v27  ;;  %744 = vmatprep.mubr.msk.f32.mxu1 %vm838_vm1, %v837_v26 }
 0x2fd   :  { %747 = vmatprep.subr.mxu1 %v837_v26 }
 0x2ff   :  { %745 = vmatmul.mubr.msk.f32.vlgmr.msra.gmra.mrb[6].mxu1 %vm283_vm2, %v111_v61 }
 0x300   :  { %748 = vmatpush3.msra.mxu1 %v731_v56  ;;  %749 = vmatprep.mubr.msk.f32.mxu1 %vm838_vm1, %v837_v26 }
 0x3ce   :  { %v442_v62 = vpop.f32.mrb[4].mxu1 }
 0x3cf   :  { %446 = vst.msk [vmem:[#allocation2] sm:$0xff] %vm283_vm2, %v442_v62  ;;  %v741_v63 = vpop.f32.mrb[5].mxu1 }
 0x3d2   :  { %v519_v0 = vpop.f32.mrb[6].mxu1 }
 0x3d3   :  { %v523_v1 = vsel %vm282_vm3, %v519_v0, -inf  ;;  %v746_v2 = vpop.f32.mrb[7].mxu1 }
 0x3d4   :  { %v524_v3 = vsel %vm361_vm4, %v523_v1, -inf }
 0x3d5   :  { %525 = vmax.xlane.f32.xlu1 %v524_v3 }
 0x462   :  { %v526_v4 = vpop.xlane.xlu1 %525 }
 0x463   :  { %v527_v5 = vsub.f32 %v523_v1, %v526_v4 }
 0x465   :  { %v528_v6 = vmul.f32 1.442695, %v527_v5 }
 0x467   :  { %809 = vpow2.f32 %v528_v6 }
 0x471   :  { %v810_v7 = vpop.eup %809 }
 0x472   :  { %v530_v8 = vsel %vm361_vm4, %v810_v7, 0.0 }
 0x473   :  { %531 = vadd.xlane.f32.xlu1 %v530_v8 }
 0x500   :  { %v532_v9 = vpop.xlane.xlu1 %531 }
 0x501   :  { %811 = vrcp.f32 %v532_v9 }
 0x50b   :  { %v812_v10 = vpop.eup %811 }
 0x50c   :  { %v534_v11 = vmul.f32 %v812_v10, %v810_v7 }
 0x50e   :  { %750 = vmatmul.mubr.msk.f32.vlgmr.msra.gmra.mrb[8].mxu1 %vm361_vm4, %v534_v11 }
 0x5e1   :  { %v604_v12 = vpop.f32.mrb[8].mxu1 }
 0x5e2   :  { %608 = vst.msk [vmem:[#allocation2 + $0x8] sm:$0xff] %vm283_vm2, %v604_v12  ;;  %v751_v13 = vpop.f32.mrb[9].mxu1 }
 0x5e3   :  { %824 = shalt.err (!%p821_p4)
}
 0x5e4   :  { %s825_s16 = scalar_lea.hbm %s993_s4, 256 }
 0x5e5   :  { %p826_p5 = scmp.ne.s32.totalorder %s993_s4, %s825_s16  ;;  %p829_p6 = scmp.lt.u32.totalorder %s825_s16, %s993_s4 }
 0x5e7   :  { %p831_p7 = pnand %p829_p6, %p826_p5 }
 0x5e9   :  { %834 = shalt.err (!%p831_p7)
}
 0x5ea   :  { %s840_s21 = smov 128   ;;  %s841_s22 = smov 8  }
 0x5eb   :  { %620 = dma.vmem_to_hbm [thread:$0]  %s615_s12, 256, %s993_s4, [#allocation3], %s840_s21, %s840_s21, %s841_s22  }
 0x5ec   :  { %835 = dma.done.wait [#allocation3], 256  }
 0x5ed   :  { %836 = vsyncadd [#allocation3], 4294967040 }
 0x5ee   :  { %624 = vsyncpa [#allocation3], 1 }

</bundles_post_ra>
